<compile_context>
chip_gen: v6e
topology: v6e:2x2x1
jax: 0.10.0
libtpu: 0.0.40
codegen_flags: <defaults>
</compile_context>

<pallas_src>
import jax
import jax.numpy as jnp
import numpy as np
from jax.experimental import pallas as pl
from jax.experimental.pallas import tpu as pltpu

N_EMBED = 40
HEAD_SIZE = 10
N_HEADS = 4
LN_EPS = 1e-5


# ----------------------------- kernel -------------------------------------- #
def block_kernel(x_ref,
                 ln1g_ref, ln1b_ref,
                 wqkv_ref, wp_ref, bp_ref,
                 w1_ref, b1_ref, w2_ref, b2_ref,
                 ln2g_ref, ln2b_ref,
                 o_ref):
    Bblk, T, C = x_ref.shape
    rows = Bblk * T
    H, hs = N_HEADS, HEAD_SIZE

    # (Bblk, T, C) -> (Bblk*T, C): big-M rows for every row-wise matmul (layout no-op).
    x2d = x_ref[...].reshape(rows, C)

    def layernorm(z, gamma, beta):
        mu = jnp.mean(z, axis=-1, keepdims=True)
        cen = z - mu
        var = jnp.mean(cen * cen, axis=-1, keepdims=True)
        return cen * jax.lax.rsqrt(var + LN_EPS) * gamma + beta

    # ---- LayerNorm 1 ----
    xn2d = layernorm(x2d, ln1g_ref[...], ln1b_ref[...])

    # ---- fused q/k/v projection for all heads: ONE (rows, C) @ (C, 3C) matmul ----
    qkv = jnp.dot(xn2d.astype(jnp.bfloat16), wqkv_ref[...],
                  preferred_element_type=jnp.float32)            # (rows, 3C) f32
    qkv3 = qkv.reshape(Bblk, T, 3 * C)
    q_all = qkv3[:, :, 0:C]          # (Bblk, T, C), head h in lanes h*hs:(h+1)*hs
    k_all = qkv3[:, :, C:2 * C]
    v_all = qkv3[:, :, 2 * C:3 * C]

    # head lane masks: 1 on the 10 lanes belonging to head h, 0 elsewhere
    lane = jax.lax.broadcasted_iota(jnp.int32, (1, 1, C), 2)
    head_masks = [((lane >= h * hs) & (lane < (h + 1) * hs)).astype(jnp.float32)
                  for h in range(H)]

    # "expanded" operands: row block h carries head h's data restricted to its own lanes,
    # so one batched matmul computes every head at once.
    q_exp = jnp.concatenate([q_all * head_masks[h] for h in range(H)], axis=1)  # (Bblk, H*T, C)
    v_exp = jnp.concatenate([v_all * head_masks[h] for h in range(H)], axis=1)  # (Bblk, H*T, C)

    # scores for all heads: s_all[b, i, h*T + j] = k_h[b, i, :] . q_h[b, j, :]
    s_all = jnp.einsum('bid,bkd->bik', k_all, q_exp,
                       preferred_element_type=jnp.float32)        # (Bblk, T, H*T)

    # softmax over each head's own T columns (torch softmax(dim=-1))
    probs = []
    for h in range(H):
        s = s_all[:, :, h * T:(h + 1) * T]
        s = s - jnp.max(s, axis=-1, keepdims=True)
        e = jnp.exp(s)
        probs.append(e * pl.reciprocal(jnp.sum(e, axis=-1, keepdims=True), approx=True))
    p_all = jnp.concatenate(probs, axis=-1)                       # (Bblk, T, H*T)

    # weighted values; the masked v_exp makes the result land directly in the
    # torch.cat([head_0, ..., head_3], -1) lane layout (no per-head concat needed).
    att = jnp.einsum('bik,bkd->bid', p_all, v_exp,
                     preferred_element_type=jnp.float32)          # (Bblk, T, C)
    att2d = att.reshape(rows, C)

    # head projection: ONE (rows, C) @ (C, C) matmul + bias
    att2d = jnp.dot(att2d.astype(jnp.bfloat16), wp_ref[...],
                    preferred_element_type=jnp.float32) + bp_ref[...]

    # residual over the LN1 output (exactly as the PyTorch module)
    x1 = xn2d + att2d

    # ---- LayerNorm 2 ----
    x2n = layernorm(x1, ln2g_ref[...], ln2b_ref[...])

    # ---- FeedForward ----
    hid = jnp.dot(x2n.astype(jnp.bfloat16), w1_ref[...],
                  preferred_element_type=jnp.float32) + b1_ref[...]
    hid = jnp.maximum(hid, 0.0)
    ff = jnp.dot(hid.astype(jnp.bfloat16), w2_ref[...],
                 preferred_element_type=jnp.float32) + b2_ref[...]

    o_ref[...] = (x2n + ff).reshape(Bblk, T, C)


# ----------------------------- wrapper -------------------------------------- #
def _grid_partition(B, T, target_rows=512):
    # >= 2 grid steps (v7x has 2 TensorCores), even count, ~target_rows rows per step.
    steps = max(2, pl.cdiv(B * T, target_rows))
    steps += steps % 2
    bblk = pl.cdiv(B, steps)
    b_pad = bblk * steps
    return bblk, steps, b_pad


def block_forward(x, params, target_rows=512):
    B, T, C = x.shape
    assert C == N_EMBED
    H, hs = N_HEADS, HEAD_SIZE
    f32, bf16 = jnp.float32, jnp.bfloat16

    # ---- wrapper-side weight packing (tiny, done once per call) ----
    w_qkv = jnp.concatenate([params["wq"], params["wk"], params["wv"]],
                            axis=1).astype(bf16)                  # (C, 3C)
    wp = params["wp"].astype(bf16)                                # (C, C)
    w1 = params["w1"].astype(bf16)
    w2 = params["w2"].astype(bf16)

    def row(v):  # (C,) -> (1, C) f32
        return v.reshape(1, C).astype(f32)

    plist = [row(params["ln1_g"]), row(params["ln1_b"]),
             w_qkv, wp, row(params["bp"]),
             w1, row(params["b1"]), w2, row(params["b2"]),
             row(params["ln2_g"]), row(params["ln2_b"])]

    # ---- batch-blocked grid; pad the batch only if needed (pad rows sliced off) ----
    bblk, steps, b_pad = _grid_partition(B, T, target_rows)
    xp = x.astype(f32)
    if b_pad != B:
        xp = jnp.pad(xp, ((0, b_pad - B), (0, 0), (0, 0)))

    x_spec = pl.BlockSpec((bblk, T, C), lambda i: (i, 0, 0))
    o_spec = pl.BlockSpec((bblk, T, C), lambda i: (i, 0, 0))
    param_specs = [pl.BlockSpec(p.shape, lambda i, _nd=p.ndim: (0,) * _nd)
                   for p in plist]

    # advisory cost estimate for the XLA scheduler
    rows = b_pad * T
    flops = (2 * rows * C * 3 * C                 # fused qkv projection
             + 2 * b_pad * T * (H * T) * C * 2    # masked score / weighted-value matmuls
             + 2 * rows * C * C * 3)              # head projection + two FFN matmuls
    transcendentals = b_pad * H * T * T + b_pad * H * T
    bytes_accessed = 4 * 2 * rows * C + sum(int(p.size) * p.dtype.itemsize for p in plist)
    ce = pl.CostEstimate(flops=flops, transcendentals=transcendentals,
                         bytes_accessed=bytes_accessed)

    out = pl.pallas_call(
        block_kernel,
        out_shape=jax.ShapeDtypeStruct((b_pad, T, C), f32),
        grid_spec=pltpu.PrefetchScalarGridSpec(
            num_scalar_prefetch=0,
            grid=(steps,),
            in_specs=[x_spec] + param_specs,
            out_specs=o_spec),
        compiler_params=pltpu.CompilerParams(
            dimension_semantics=("parallel",)),
        cost_estimate=ce,
    )(xp, *plist)

    return out[:B] if b_pad != B else out


# ----------------------------- reference ------------------------------------ #
def block_reference(x, p):
    def ln(z, g, b):
        mu = jnp.mean(z, axis=-1, keepdims=True)
        var = jnp.mean((z - mu) ** 2, axis=-1, keepdims=True)
        return (z - mu) / jnp.sqrt(var + LN_EPS) * g + b

    xn = ln(x, p["ln1_g"], p["ln1_b"])
    q = xn @ p["wq"]
    k = xn @ p["wk"]
    v = xn @ p["wv"]
    outs = []
    for h in range(N_HEADS):
        s = h * HEAD_SIZE
        qh, kh, vh = (q[..., s:s + HEAD_SIZE], k[..., s:s + HEAD_SIZE],
                      v[..., s:s + HEAD_SIZE])
        w = kh @ jnp.swapaxes(qh, -1, -2)
        w = jax.nn.softmax(w, axis=-1)
        outs.append(w @ vh)
    att = jnp.concatenate(outs, axis=-1) @ p["wp"] + p["bp"]
    x1 = xn + att
    x2 = ln(x1, p["ln2_g"], p["ln2_b"])
    ff = jnp.maximum(x2 @ p["w1"] + p["b1"], 0.0) @ p["w2"] + p["b2"]
    return x2 + ff


def init_params(key):
    ks = jax.random.split(key, 12)
    C = N_EMBED
    scale = 0.1
    return {
        "ln1_g": 1.0 + scale * jax.random.normal(ks[0], (C,), jnp.float32),
        "ln1_b": scale * jax.random.normal(ks[1], (C,), jnp.float32),
        # per-head Wq/Wk/Wv (C, head_size) packed along the output dim -> (C, C)
        "wq": scale * jax.random.normal(ks[2], (C, C), jnp.float32),
        "wk": scale * jax.random.normal(ks[3], (C, C), jnp.float32),
        "wv": scale * jax.random.normal(ks[4], (C, C), jnp.float32),
        "wp": scale * jax.random.normal(ks[5], (C, C), jnp.float32),
        "bp": scale * jax.random.normal(ks[6], (C,), jnp.float32),
        "w1": scale * jax.random.normal(ks[7], (C, C), jnp.float32),
        "b1": scale * jax.random.normal(ks[8], (C,), jnp.float32),
        "w2": scale * jax.random.normal(ks[9], (C, C), jnp.float32),
        "b2": scale * jax.random.normal(ks[10], (C,), jnp.float32),
        "ln2_g": 1.0 + scale * jax.random.normal(ks[11], (C,), jnp.float32),
        "ln2_b": jnp.zeros((C,), jnp.float32),
    }


if __name__ == "__main__":
    key = jax.random.PRNGKey(0)
    kx, kx2, kp = jax.random.split(key, 3)
    params = init_params(kp)

    # small test at the module's natural shapes
    B, T = 2, 8
    x = jax.random.normal(kx, (B, T, N_EMBED), jnp.float32)
    out = jax.block_until_ready(block_forward(x, params))
    ref = block_reference(x, params)
    np.testing.assert_allclose(np.asarray(out), np.asarray(ref), atol=2e-2, rtol=2e-2)

    # larger, non-divisible batch: exercises the multi-step grid and batch padding
    B2, T2 = 51, 8
    x2 = jax.random.normal(kx2, (B2, T2, N_EMBED), jnp.float32)
    out2 = jax.block_until_ready(block_forward(x2, params))
    ref2 = block_reference(x2, params)
    np.testing.assert_allclose(np.asarray(out2), np.asarray(ref2), atol=2e-2, rtol=2e-2)

    print("KERNEL_OK")
</pallas_src>

<mosaic_0001>
module attributes {stable_mosaic.version = 11 : i64} {
  func.func @block_kernel(%arg0: i32, %arg1: memref<1x8x40xf32, #tpu.memory_space<vmem>>, %arg2: memref<1x40xf32, #tpu.memory_space<vmem>>, %arg3: memref<1x40xf32, #tpu.memory_space<vmem>>, %arg4: memref<40x120xbf16, #tpu.memory_space<vmem>>, %arg5: memref<40x40xbf16, #tpu.memory_space<vmem>>, %arg6: memref<1x40xf32, #tpu.memory_space<vmem>>, %arg7: memref<40x40xbf16, #tpu.memory_space<vmem>>, %arg8: memref<1x40xf32, #tpu.memory_space<vmem>>, %arg9: memref<40x40xbf16, #tpu.memory_space<vmem>>, %arg10: memref<1x40xf32, #tpu.memory_space<vmem>>, %arg11: memref<1x40xf32, #tpu.memory_space<vmem>>, %arg12: memref<1x40xf32, #tpu.memory_space<vmem>>, %arg13: memref<1x8x40xf32, #tpu.memory_space<vmem>>) attributes {dimension_semantics = [#tpu.dimension_semantics<parallel>], iteration_bounds = array<i64: 2>, scalar_prefetch = 0 : i64, scratch_operands = 0 : i64, tpu.core_type = #tpu.core_type<tc>, window_params = [{transform_indices = @transform_0, window_bounds = array<i64: 1, 8, 40>}, {pipeline_mode = #tpu.pipeline_mode<synchronous>, transform_indices = @transform_1, window_bounds = array<i64: 1, 40>}, {pipeline_mode = #tpu.pipeline_mode<synchronous>, transform_indices = @transform_2, window_bounds = array<i64: 1, 40>}, {pipeline_mode = #tpu.pipeline_mode<synchronous>, transform_indices = @transform_3, window_bounds = array<i64: 40, 120>}, {pipeline_mode = #tpu.pipeline_mode<synchronous>, transform_indices = @transform_4, window_bounds = array<i64: 40, 40>}, {pipeline_mode = #tpu.pipeline_mode<synchronous>, transform_indices = @transform_5, window_bounds = array<i64: 1, 40>}, {pipeline_mode = #tpu.pipeline_mode<synchronous>, transform_indices = @transform_6, window_bounds = array<i64: 40, 40>}, {pipeline_mode = #tpu.pipeline_mode<synchronous>, transform_indices = @transform_7, window_bounds = array<i64: 1, 40>}, {pipeline_mode = #tpu.pipeline_mode<synchronous>, transform_indices = @transform_8, window_bounds = array<i64: 40, 40>}, {pipeline_mode = #tpu.pipeline_mode<synchronous>, transform_indices = @transform_9, window_bounds = array<i64: 1, 40>}, {pipeline_mode = #tpu.pipeline_mode<synchronous>, transform_indices = @transform_10, window_bounds = array<i64: 1, 40>}, {pipeline_mode = #tpu.pipeline_mode<synchronous>, transform_indices = @transform_11, window_bounds = array<i64: 1, 40>}, {transform_indices = @transform_12, window_bounds = array<i64: 1, 8, 40>}]} {
    %c0 = arith.constant 0 : index
    %c0_0 = arith.constant 0 : index
    %c0_1 = arith.constant 0 : index
    %0 = vector.load %arg1[%c0, %c0_0, %c0_1] : memref<1x8x40xf32, #tpu.memory_space<vmem>>, vector<1x8x40xf32>
    %1 = vector.shape_cast %0 : vector<1x8x40xf32> to vector<8x40xf32>
    %c0_2 = arith.constant 0 : index
    %c0_3 = arith.constant 0 : index
    %2 = vector.load %arg2[%c0_2, %c0_3] : memref<1x40xf32, #tpu.memory_space<vmem>>, vector<1x40xf32>
    %c0_4 = arith.constant 0 : index
    %c0_5 = arith.constant 0 : index
    %3 = vector.load %arg3[%c0_4, %c0_5] : memref<1x40xf32, #tpu.memory_space<vmem>>, vector<1x40xf32>
    %cst = arith.constant dense<0.000000e+00> : vector<8xf32>
    %4 = vector.multi_reduction <add>, %1, %cst [1] : vector<8x40xf32> to vector<8xf32>
    %5 = vector.shape_cast %4 : vector<8xf32> to vector<8x1xf32>
    %cst_6 = arith.constant 4.000000e+01 : f32
    %6 = vector.broadcast %cst_6 : f32 to vector<8x1xf32>
    %7 = arith.divf %5, %6 : vector<8x1xf32>
    %8 = vector.broadcast %7 : vector<8x1xf32> to vector<8x40xf32>
    %9 = arith.subf %1, %8 : vector<8x40xf32>
    %10 = arith.mulf %9, %9 : vector<8x40xf32>
    %cst_7 = arith.constant dense<0.000000e+00> : vector<8xf32>
    %11 = vector.multi_reduction <add>, %10, %cst_7 [1] : vector<8x40xf32> to vector<8xf32>
    %12 = vector.shape_cast %11 : vector<8xf32> to vector<8x1xf32>
    %cst_8 = arith.constant 4.000000e+01 : f32
    %13 = vector.broadcast %cst_8 : f32 to vector<8x1xf32>
    %14 = arith.divf %12, %13 : vector<8x1xf32>
    %cst_9 = arith.constant 9.99999974E-6 : f32
    %15 = vector.broadcast %cst_9 : f32 to vector<8x1xf32>
    %16 = arith.addf %14, %15 : vector<8x1xf32>
    %17 = math.rsqrt %16 : vector<8x1xf32>
    %18 = vector.broadcast %17 : vector<8x1xf32> to vector<8x40xf32>
    %19 = arith.mulf %9, %18 : vector<8x40xf32>
    %20 = vector.broadcast %2 : vector<1x40xf32> to vector<8x40xf32>
    %21 = arith.mulf %19, %20 : vector<8x40xf32>
    %22 = vector.broadcast %3 : vector<1x40xf32> to vector<8x40xf32>
    %23 = arith.addf %21, %22 : vector<8x40xf32>
    %24 = arith.truncf %23 : vector<8x40xf32> to vector<8x40xbf16>
    %c0_10 = arith.constant 0 : index
    %c0_11 = arith.constant 0 : index
    %25 = vector.load %arg4[%c0_10, %c0_11] : memref<40x120xbf16, #tpu.memory_space<vmem>>, vector<40x120xbf16>
    %cst_12 = arith.constant dense<0.000000e+00> : vector<8x120xf32>
    %26 = tpu.matmul %24, %25, %cst_12 {dimension_numbers = #tpu.dot_dimension_numbers<[1], [0], [0], [1], [0, 0, 1, 1], [], []>} : vector<8x40xbf16>, vector<40x120xbf16>, vector<8x120xf32> -> vector<8x120xf32>
    %27 = vector.shape_cast %26 : vector<8x120xf32> to vector<1x8x120xf32>
    %28 = vector.extract_strided_slice %27 {offsets = [0, 0, 0], sizes = [1, 8, 40], strides = [1, 1, 1]} : vector<1x8x120xf32> to vector<1x8x40xf32>
    %29 = vector.extract_strided_slice %27 {offsets = [0, 0, 40], sizes = [1, 8, 40], strides = [1, 1, 1]} : vector<1x8x120xf32> to vector<1x8x40xf32>
    %30 = vector.extract_strided_slice %27 {offsets = [0, 0, 80], sizes = [1, 8, 40], strides = [1, 1, 1]} : vector<1x8x120xf32> to vector<1x8x40xf32>
    %31 = tpu.iota {dimensions = array<i32: 2>} : vector<1x1x40xi32>
    %c0_i32 = arith.constant 0 : i32
    %32 = vector.broadcast %c0_i32 : i32 to vector<1x1x40xi32>
    %33 = arith.cmpi sge, %31, %32 : vector<1x1x40xi32>
    %c10_i32 = arith.constant 10 : i32
    %34 = vector.broadcast %c10_i32 : i32 to vector<1x1x40xi32>
    %35 = arith.cmpi slt, %31, %34 : vector<1x1x40xi32>
    %36 = arith.andi %33, %35 : vector<1x1x40xi1>
    %37 = arith.extui %36 : vector<1x1x40xi1> to vector<1x1x40xi32>
    %38 = arith.sitofp %37 : vector<1x1x40xi32> to vector<1x1x40xf32>
    %c10_i32_13 = arith.constant 10 : i32
    %39 = vector.broadcast %c10_i32_13 : i32 to vector<1x1x40xi32>
    %40 = arith.cmpi sge, %31, %39 : vector<1x1x40xi32>
    %c20_i32 = arith.constant 20 : i32
    %41 = vector.broadcast %c20_i32 : i32 to vector<1x1x40xi32>
    %42 = arith.cmpi slt, %31, %41 : vector<1x1x40xi32>
    %43 = arith.andi %40, %42 : vector<1x1x40xi1>
    %44 = arith.extui %43 : vector<1x1x40xi1> to vector<1x1x40xi32>
    %45 = arith.sitofp %44 : vector<1x1x40xi32> to vector<1x1x40xf32>
    %c20_i32_14 = arith.constant 20 : i32
    %46 = vector.broadcast %c20_i32_14 : i32 to vector<1x1x40xi32>
    %47 = arith.cmpi sge, %31, %46 : vector<1x1x40xi32>
    %c30_i32 = arith.constant 30 : i32
    %48 = vector.broadcast %c30_i32 : i32 to vector<1x1x40xi32>
    %49 = arith.cmpi slt, %31, %48 : vector<1x1x40xi32>
    %50 = arith.andi %47, %49 : vector<1x1x40xi1>
    %51 = arith.extui %50 : vector<1x1x40xi1> to vector<1x1x40xi32>
    %52 = arith.sitofp %51 : vector<1x1x40xi32> to vector<1x1x40xf32>
    %c30_i32_15 = arith.constant 30 : i32
    %53 = vector.broadcast %c30_i32_15 : i32 to vector<1x1x40xi32>
    %54 = arith.cmpi sge, %31, %53 : vector<1x1x40xi32>
    %c40_i32 = arith.constant 40 : i32
    %55 = vector.broadcast %c40_i32 : i32 to vector<1x1x40xi32>
    %56 = arith.cmpi slt, %31, %55 : vector<1x1x40xi32>
    %57 = arith.andi %54, %56 : vector<1x1x40xi1>
    %58 = arith.extui %57 : vector<1x1x40xi1> to vector<1x1x40xi32>
    %59 = arith.sitofp %58 : vector<1x1x40xi32> to vector<1x1x40xf32>
    %60 = vector.broadcast %38 : vector<1x1x40xf32> to vector<1x8x40xf32>
    %61 = arith.mulf %28, %60 : vector<1x8x40xf32>
    %62 = vector.broadcast %45 : vector<1x1x40xf32> to vector<1x8x40xf32>
    %63 = arith.mulf %28, %62 : vector<1x8x40xf32>
    %64 = vector.broadcast %52 : vector<1x1x40xf32> to vector<1x8x40xf32>
    %65 = arith.mulf %28, %64 : vector<1x8x40xf32>
    %66 = vector.broadcast %59 : vector<1x1x40xf32> to vector<1x8x40xf32>
    %67 = arith.mulf %28, %66 : vector<1x8x40xf32>
    %68 = tpu.concatenate %61, %63, %65, %67 in 1 : vector<1x8x40xf32>, vector<1x8x40xf32>, vector<1x8x40xf32>, vector<1x8x40xf32> -> vector<1x32x40xf32>
    %69 = vector.broadcast %38 : vector<1x1x40xf32> to vector<1x8x40xf32>
    %70 = arith.mulf %30, %69 : vector<1x8x40xf32>
    %71 = vector.broadcast %45 : vector<1x1x40xf32> to vector<1x8x40xf32>
    %72 = arith.mulf %30, %71 : vector<1x8x40xf32>
    %73 = vector.broadcast %52 : vector<1x1x40xf32> to vector<1x8x40xf32>
    %74 = arith.mulf %30, %73 : vector<1x8x40xf32>
    %75 = vector.broadcast %59 : vector<1x1x40xf32> to vector<1x8x40xf32>
    %76 = arith.mulf %30, %75 : vector<1x8x40xf32>
    %77 = tpu.concatenate %70, %72, %74, %76 in 1 : vector<1x8x40xf32>, vector<1x8x40xf32>, vector<1x8x40xf32>, vector<1x8x40xf32> -> vector<1x32x40xf32>
    "tpu.trace_start"() <{level = 10 : i32, message = "bid,bkd->bik"}> : () -> ()
    %cst_16 = arith.constant dense<0.000000e+00> : vector<1x8x32xf32>
    %78 = tpu.matmul %29, %68, %cst_16 {dimension_numbers = #tpu.dot_dimension_numbers<[2], [2], [1], [1], [0, 0, 0, 1, 1, 1], [0], [0]>} : vector<1x8x40xf32>, vector<1x32x40xf32>, vector<1x8x32xf32> -> vector<1x8x32xf32>
    "tpu.trace_stop"() : () -> ()
    %79 = vector.extract_strided_slice %78 {offsets = [0, 0, 0], sizes = [1, 8, 8], strides = [1, 1, 1]} : vector<1x8x32xf32> to vector<1x8x8xf32>
    %cst_17 = arith.constant dense<0xFF800000> : vector<1x8xf32>
    %80 = vector.multi_reduction <maximumf>, %79, %cst_17 [2] : vector<1x8x8xf32> to vector<1x8xf32>
    %81 = vector.shape_cast %80 : vector<1x8xf32> to vector<1x8x1xf32>
    %82 = vector.broadcast %81 : vector<1x8x1xf32> to vector<1x8x8xf32>
    %83 = arith.subf %79, %82 : vector<1x8x8xf32>
    %84 = math.exp %83 : vector<1x8x8xf32>
    %cst_18 = arith.constant dense<0.000000e+00> : vector<1x8xf32>
    %85 = vector.multi_reduction <add>, %84, %cst_18 [2] : vector<1x8x8xf32> to vector<1x8xf32>
    %86 = vector.shape_cast %85 : vector<1x8xf32> to vector<1x8x1xf32>
    %87 = tpu.reciprocal %86 {approx = true} : vector<1x8x1xf32> -> vector<1x8x1xf32>
    %88 = vector.broadcast %87 : vector<1x8x1xf32> to vector<1x8x8xf32>
    %89 = arith.mulf %84, %88 : vector<1x8x8xf32>
    %90 = vector.extract_strided_slice %78 {offsets = [0, 0, 8], sizes = [1, 8, 8], strides = [1, 1, 1]} : vector<1x8x32xf32> to vector<1x8x8xf32>
    %cst_19 = arith.constant dense<0xFF800000> : vector<1x8xf32>
    %91 = vector.multi_reduction <maximumf>, %90, %cst_19 [2] : vector<1x8x8xf32> to vector<1x8xf32>
    %92 = vector.shape_cast %91 : vector<1x8xf32> to vector<1x8x1xf32>
    %93 = vector.broadcast %92 : vector<1x8x1xf32> to vector<1x8x8xf32>
    %94 = arith.subf %90, %93 : vector<1x8x8xf32>
    %95 = math.exp %94 : vector<1x8x8xf32>
    %cst_20 = arith.constant dense<0.000000e+00> : vector<1x8xf32>
    %96 = vector.multi_reduction <add>, %95, %cst_20 [2] : vector<1x8x8xf32> to vector<1x8xf32>
    %97 = vector.shape_cast %96 : vector<1x8xf32> to vector<1x8x1xf32>
    %98 = tpu.reciprocal %97 {approx = true} : vector<1x8x1xf32> -> vector<1x8x1xf32>
    %99 = vector.broadcast %98 : vector<1x8x1xf32> to vector<1x8x8xf32>
    %100 = arith.mulf %95, %99 : vector<1x8x8xf32>
    %101 = vector.extract_strided_slice %78 {offsets = [0, 0, 16], sizes = [1, 8, 8], strides = [1, 1, 1]} : vector<1x8x32xf32> to vector<1x8x8xf32>
    %cst_21 = arith.constant dense<0xFF800000> : vector<1x8xf32>
    %102 = vector.multi_reduction <maximumf>, %101, %cst_21 [2] : vector<1x8x8xf32> to vector<1x8xf32>
    %103 = vector.shape_cast %102 : vector<1x8xf32> to vector<1x8x1xf32>
    %104 = vector.broadcast %103 : vector<1x8x1xf32> to vector<1x8x8xf32>
    %105 = arith.subf %101, %104 : vector<1x8x8xf32>
    %106 = math.exp %105 : vector<1x8x8xf32>
    %cst_22 = arith.constant dense<0.000000e+00> : vector<1x8xf32>
    %107 = vector.multi_reduction <add>, %106, %cst_22 [2] : vector<1x8x8xf32> to vector<1x8xf32>
    %108 = vector.shape_cast %107 : vector<1x8xf32> to vector<1x8x1xf32>
    %109 = tpu.reciprocal %108 {approx = true} : vector<1x8x1xf32> -> vector<1x8x1xf32>
    %110 = vector.broadcast %109 : vector<1x8x1xf32> to vector<1x8x8xf32>
    %111 = arith.mulf %106, %110 : vector<1x8x8xf32>
    %112 = vector.extract_strided_slice %78 {offsets = [0, 0, 24], sizes = [1, 8, 8], strides = [1, 1, 1]} : vector<1x8x32xf32> to vector<1x8x8xf32>
    %cst_23 = arith.constant dense<0xFF800000> : vector<1x8xf32>
    %113 = vector.multi_reduction <maximumf>, %112, %cst_23 [2] : vector<1x8x8xf32> to vector<1x8xf32>
    %114 = vector.shape_cast %113 : vector<1x8xf32> to vector<1x8x1xf32>
    %115 = vector.broadcast %114 : vector<1x8x1xf32> to vector<1x8x8xf32>
    %116 = arith.subf %112, %115 : vector<1x8x8xf32>
    %117 = math.exp %116 : vector<1x8x8xf32>
    %cst_24 = arith.constant dense<0.000000e+00> : vector<1x8xf32>
    %118 = vector.multi_reduction <add>, %117, %cst_24 [2] : vector<1x8x8xf32> to vector<1x8xf32>
    %119 = vector.shape_cast %118 : vector<1x8xf32> to vector<1x8x1xf32>
    %120 = tpu.reciprocal %119 {approx = true} : vector<1x8x1xf32> -> vector<1x8x1xf32>
    %121 = vector.broadcast %120 : vector<1x8x1xf32> to vector<1x8x8xf32>
    %122 = arith.mulf %117, %121 : vector<1x8x8xf32>
    %123 = tpu.concatenate %89, %100, %111, %122 in 2 : vector<1x8x8xf32>, vector<1x8x8xf32>, vector<1x8x8xf32>, vector<1x8x8xf32> -> vector<1x8x32xf32>
    "tpu.trace_start"() <{level = 10 : i32, message = "bik,bkd->bid"}> : () -> ()
    %cst_25 = arith.constant dense<0.000000e+00> : vector<1x8x40xf32>
    %124 = tpu.matmul %123, %77, %cst_25 {dimension_numbers = #tpu.dot_dimension_numbers<[2], [1], [1], [2], [0, 0, 0, 1, 1, 2], [0], [0]>} : vector<1x8x32xf32>, vector<1x32x40xf32>, vector<1x8x40xf32> -> vector<1x8x40xf32>
    "tpu.trace_stop"() : () -> ()
    %125 = vector.shape_cast %124 : vector<1x8x40xf32> to vector<8x40xf32>
    %126 = arith.truncf %125 : vector<8x40xf32> to vector<8x40xbf16>
    %c0_26 = arith.constant 0 : index
    %c0_27 = arith.constant 0 : index
    %127 = vector.load %arg5[%c0_26, %c0_27] : memref<40x40xbf16, #tpu.memory_space<vmem>>, vector<40x40xbf16>
    %cst_28 = arith.constant dense<0.000000e+00> : vector<8x40xf32>
    %128 = tpu.matmul %126, %127, %cst_28 {dimension_numbers = #tpu.dot_dimension_numbers<[1], [0], [0], [1], [0, 0, 1, 1], [], []>} : vector<8x40xbf16>, vector<40x40xbf16>, vector<8x40xf32> -> vector<8x40xf32>
    %c0_29 = arith.constant 0 : index
    %c0_30 = arith.constant 0 : index
    %129 = vector.load %arg6[%c0_29, %c0_30] : memref<1x40xf32, #tpu.memory_space<vmem>>, vector<1x40xf32>
    %130 = vector.broadcast %129 : vector<1x40xf32> to vector<8x40xf32>
    %131 = arith.addf %128, %130 : vector<8x40xf32>
    %132 = arith.addf %23, %131 : vector<8x40xf32>
    %c0_31 = arith.constant 0 : index
    %c0_32 = arith.constant 0 : index
    %133 = vector.load %arg11[%c0_31, %c0_32] : memref<1x40xf32, #tpu.memory_space<vmem>>, vector<1x40xf32>
    %c0_33 = arith.constant 0 : index
    %c0_34 = arith.constant 0 : index
    %134 = vector.load %arg12[%c0_33, %c0_34] : memref<1x40xf32, #tpu.memory_space<vmem>>, vector<1x40xf32>
    %cst_35 = arith.constant dense<0.000000e+00> : vector<8xf32>
    %135 = vector.multi_reduction <add>, %132, %cst_35 [1] : vector<8x40xf32> to vector<8xf32>
    %136 = vector.shape_cast %135 : vector<8xf32> to vector<8x1xf32>
    %cst_36 = arith.constant 4.000000e+01 : f32
    %137 = vector.broadcast %cst_36 : f32 to vector<8x1xf32>
    %138 = arith.divf %136, %137 : vector<8x1xf32>
    %139 = vector.broadcast %138 : vector<8x1xf32> to vector<8x40xf32>
    %140 = arith.subf %132, %139 : vector<8x40xf32>
    %141 = arith.mulf %140, %140 : vector<8x40xf32>
    %cst_37 = arith.constant dense<0.000000e+00> : vector<8xf32>
    %142 = vector.multi_reduction <add>, %141, %cst_37 [1] : vector<8x40xf32> to vector<8xf32>
    %143 = vector.shape_cast %142 : vector<8xf32> to vector<8x1xf32>
    %cst_38 = arith.constant 4.000000e+01 : f32
    %144 = vector.broadcast %cst_38 : f32 to vector<8x1xf32>
    %145 = arith.divf %143, %144 : vector<8x1xf32>
    %cst_39 = arith.constant 9.99999974E-6 : f32
    %146 = vector.broadcast %cst_39 : f32 to vector<8x1xf32>
    %147 = arith.addf %145, %146 : vector<8x1xf32>
    %148 = math.rsqrt %147 : vector<8x1xf32>
    %149 = vector.broadcast %148 : vector<8x1xf32> to vector<8x40xf32>
    %150 = arith.mulf %140, %149 : vector<8x40xf32>
    %151 = vector.broadcast %133 : vector<1x40xf32> to vector<8x40xf32>
    %152 = arith.mulf %150, %151 : vector<8x40xf32>
    %153 = vector.broadcast %134 : vector<1x40xf32> to vector<8x40xf32>
    %154 = arith.addf %152, %153 : vector<8x40xf32>
    %155 = arith.truncf %154 : vector<8x40xf32> to vector<8x40xbf16>
    %c0_40 = arith.constant 0 : index
    %c0_41 = arith.constant 0 : index
    %156 = vector.load %arg7[%c0_40, %c0_41] : memref<40x40xbf16, #tpu.memory_space<vmem>>, vector<40x40xbf16>
    %cst_42 = arith.constant dense<0.000000e+00> : vector<8x40xf32>
    %157 = tpu.matmul %155, %156, %cst_42 {dimension_numbers = #tpu.dot_dimension_numbers<[1], [0], [0], [1], [0, 0, 1, 1], [], []>} : vector<8x40xbf16>, vector<40x40xbf16>, vector<8x40xf32> -> vector<8x40xf32>
    %c0_43 = arith.constant 0 : index
    %c0_44 = arith.constant 0 : index
    %158 = vector.load %arg8[%c0_43, %c0_44] : memref<1x40xf32, #tpu.memory_space<vmem>>, vector<1x40xf32>
    %159 = vector.broadcast %158 : vector<1x40xf32> to vector<8x40xf32>
    %160 = arith.addf %157, %159 : vector<8x40xf32>
    %cst_45 = arith.constant 0.000000e+00 : f32
    %161 = vector.broadcast %cst_45 : f32 to vector<8x40xf32>
    %162 = arith.maximumf %160, %161 : vector<8x40xf32>
    %163 = arith.truncf %162 : vector<8x40xf32> to vector<8x40xbf16>
    %c0_46 = arith.constant 0 : index
    %c0_47 = arith.constant 0 : index
    %164 = vector.load %arg9[%c0_46, %c0_47] : memref<40x40xbf16, #tpu.memory_space<vmem>>, vector<40x40xbf16>
    %cst_48 = arith.constant dense<0.000000e+00> : vector<8x40xf32>
    %165 = tpu.matmul %163, %164, %cst_48 {dimension_numbers = #tpu.dot_dimension_numbers<[1], [0], [0], [1], [0, 0, 1, 1], [], []>} : vector<8x40xbf16>, vector<40x40xbf16>, vector<8x40xf32> -> vector<8x40xf32>
    %c0_49 = arith.constant 0 : index
    %c0_50 = arith.constant 0 : index
    %166 = vector.load %arg10[%c0_49, %c0_50] : memref<1x40xf32, #tpu.memory_space<vmem>>, vector<1x40xf32>
    %167 = vector.broadcast %166 : vector<1x40xf32> to vector<8x40xf32>
    %168 = arith.addf %165, %167 : vector<8x40xf32>
    %169 = arith.addf %154, %168 : vector<8x40xf32>
    %170 = vector.shape_cast %169 : vector<8x40xf32> to vector<1x8x40xf32>
    %c0_51 = arith.constant 0 : index
    %c0_52 = arith.constant 0 : index
    %c0_53 = arith.constant 0 : index
    %171 = vector.load %arg13[%c0_51, %c0_52, %c0_53] : memref<1x8x40xf32, #tpu.memory_space<vmem>>, vector<1x8x40xf32>
    tpu.vector_store %arg13[%c0_51, %c0_52, %c0_53], %170 {strides = array<i32>} : memref<1x8x40xf32, #tpu.memory_space<vmem>>, vector<1x8x40xf32>,
    return
  }
  func.func @transform_0(%arg0: i32) -> (i32, i32, i32) {
    %c0_i32 = arith.constant 0 : i32
    %c0_i32_0 = arith.constant 0 : i32
    %c0_i32_1 = arith.constant 0 : i32
    return %arg0, %c0_i32, %c0_i32_0 : i32, i32, i32
  }
  func.func @transform_1(%arg0: i32) -> (i32, i32) {
    %c0_i32 = arith.constant 0 : i32
    %c0_i32_0 = arith.constant 0 : i32
    %c0_i32_1 = arith.constant 0 : i32
    return %c0_i32, %c0_i32_0 : i32, i32
  }
  func.func @transform_2(%arg0: i32) -> (i32, i32) {
    %c0_i32 = arith.constant 0 : i32
    %c0_i32_0 = arith.constant 0 : i32
    %c0_i32_1 = arith.constant 0 : i32
    return %c0_i32, %c0_i32_0 : i32, i32
  }
  func.func @transform_3(%arg0: i32) -> (i32, i32) {
    %c0_i32 = arith.constant 0 : i32
    %c0_i32_0 = arith.constant 0 : i32
    %c0_i32_1 = arith.constant 0 : i32
    return %c0_i32, %c0_i32_0 : i32, i32
  }
  func.func @transform_4(%arg0: i32) -> (i32, i32) {
    %c0_i32 = arith.constant 0 : i32
    %c0_i32_0 = arith.constant 0 : i32
    %c0_i32_1 = arith.constant 0 : i32
    return %c0_i32, %c0_i32_0 : i32, i32
  }
  func.func @transform_5(%arg0: i32) -> (i32, i32) {
    %c0_i32 = arith.constant 0 : i32
    %c0_i32_0 = arith.constant 0 : i32
    %c0_i32_1 = arith.constant 0 : i32
    return %c0_i32, %c0_i32_0 : i32, i32
  }
  func.func @transform_6(%arg0: i32) -> (i32, i32) {
    %c0_i32 = arith.constant 0 : i32
    %c0_i32_0 = arith.constant 0 : i32
    %c0_i32_1 = arith.constant 0 : i32
    return %c0_i32, %c0_i32_0 : i32, i32
  }
  func.func @transform_7(%arg0: i32) -> (i32, i32) {
    %c0_i32 = arith.constant 0 : i32
    %c0_i32_0 = arith.constant 0 : i32
    %c0_i32_1 = arith.constant 0 : i32
    return %c0_i32, %c0_i32_0 : i32, i32
  }
  func.func @transform_8(%arg0: i32) -> (i32, i32) {
    %c0_i32 = arith.constant 0 : i32
    %c0_i32_0 = arith.constant 0 : i32
    %c0_i32_1 = arith.constant 0 : i32
    return %c0_i32, %c0_i32_0 : i32, i32
  }
  func.func @transform_9(%arg0: i32) -> (i32, i32) {
    %c0_i32 = arith.constant 0 : i32
    %c0_i32_0 = arith.constant 0 : i32
    %c0_i32_1 = arith.constant 0 : i32
    return %c0_i32, %c0_i32_0 : i32, i32
  }
  func.func @transform_10(%arg0: i32) -> (i32, i32) {
    %c0_i32 = arith.constant 0 : i32
    %c0_i32_0 = arith.constant 0 : i32
    %c0_i32_1 = arith.constant 0 : i32
    return %c0_i32, %c0_i32_0 : i32, i32
  }
  func.func @transform_11(%arg0: i32) -> (i32, i32) {
    %c0_i32 = arith.constant 0 : i32
    %c0_i32_0 = arith.constant 0 : i32
    %c0_i32_1 = arith.constant 0 : i32
    return %c0_i32, %c0_i32_0 : i32, i32
  }
  func.func @transform_12(%arg0: i32) -> (i32, i32, i32) {
    %c0_i32 = arith.constant 0 : i32
    %c0_i32_0 = arith.constant 0 : i32
    %c0_i32_1 = arith.constant 0 : i32
    return %arg0, %c0_i32, %c0_i32_0 : i32, i32, i32
  }
}

</mosaic_0001>

<bundles_post_ra>
// kernel: tpu_custom_call.1
= control target key start
LH: loop header
LB: loop body
LE: loop exit
PB: predicated region body
PF: predicated region fallthrough
CT: control target
= control target key end

     0   :  { %s2154_s0 = inlined_call_operand.hbm [shape: f32[2,8,40], index: 0, kind: input, shape index: {}]   ;;  %s2155_s1 = inlined_call_operand.vmem [shape: f32[1,40], index: 1, kind: input, shape index: {}]   ;;  %s2156_s2 = inlined_call_operand.vmem [shape: f32[1,40], index: 2, kind: input, shape index: {}]   ;;  %s2157_s3 = inlined_call_operand.hbm [shape: bf16[40,120], index: 3, kind: input, shape index: {}]   ;;  %s2158_s4 = inlined_call_operand.hbm [shape: bf16[40,40], index: 4, kind: input, shape index: {}]   ;;  %s2159_s5 = inlined_call_operand.vmem [shape: f32[1,40], index: 5, kind: input, shape index: {}]   ;;  %s2160_s6 = inlined_call_operand.hbm [shape: bf16[40,40], index: 6, kind: input, shape index: {}]   ;;  %s2161_s7 = inlined_call_operand.vmem [shape: f32[1,40], index: 7, kind: input, shape index: {}]   ;;  %s2162_s8 = inlined_call_operand.hbm [shape: bf16[40,40], index: 8, kind: input, shape index: {}]   ;;  %s2163_s9 = inlined_call_operand.vmem [shape: f32[1,40], index: 9, kind: input, shape index: {}]   ;;  %s2164_s10 = inlined_call_operand.vmem [shape: f32[1,40], index: 10, kind: input, shape index: {}]   ;;  %s2165_s11 = inlined_call_operand.vmem [shape: f32[1,40], index: 11, kind: input, shape index: {}]   ;;  %s2166_s12 = inlined_call_operand.hbm [shape: f32[2,8,40], index: 12, kind: output, shape index: {}]  }
   0x1   :  { %2174 = sst [smem:[#allocation19_spill]] %s2157_s3 }
   0x2   :  { %2175 = sst [smem:[#allocation20_spill]] %s2158_s4 }
   0x3   :  { %2176 = sst [smem:[#allocation21_spill]] %s2160_s6 }
   0x4   :  { %2177 = sst [smem:[#allocation22_spill]] %s2162_s8 }
   0x5   :  { %17 = vsyncpa [#allocation3], 0 }
   0x6   :  { %19 = vsyncpa [#allocation3 + $0x1], 0 }
   0x7   :  { %20 = vsyncpa [#allocation6], 0 }
   0x8   :  { %21 = vsyncpa [#allocation9], 0 }
   0x9   :  { %22 = vsyncpa [#allocation4], 0 }
   0xa   :  { %24 = vsyncpa [#allocation4 + $0x1], 0  ;;  %s1810_s21 = smov 0   ;;  %s1812_s22 = smov 0  }
   0xb   :  { %s1814_s23 = smov 0   ;;  %s1816_s24 = smov 0  }
   0xc LB: > { %2178 = sst [smem:[#allocation16_spill]] %s1723_s23  ;;  %s1729_s25 = smov [#allocation5]   ;;  %s1727_s24 = sphi %s1816_s24, %s2201_s24   ;;  %s1723_s23 = sphi %s1814_s23, %s2203_s23   ;;  %s1719_s22 = sphi %s1812_s22, %s2205_s22   ;;  %s1715_s21 = sphi %s1810_s21, %s2204_s21  }
   0xd   : > { %s336_s26 = sshll.u32 %s1729_s25, 4  ;;  %s1831_s27 = sadd.s32 4294967295, %s1727_s24   ;;  %s337_s26 = int_to_ptr.vmem [resolvable:$true] %s336_s26 }
   0xe   : > { %p1254_p0 = scmp.ge.s32.totalorder %s1727_s24, 1  ;;  %p2167_p1 = scmp.eq.s32.totalorder %s1831_s27, 0 }
   0xf   : > { %p318_p2 = scmp.lt.s32.totalorder %s1727_s24, 3  ;;  %s1730_s29 = smov [#allocation8]  }
  0x10   : > { %s365_s30 = sshll.u32 %s1730_s29, 4  ;;  %s1731_s14 = smov [#allocation7]   ;;  %s1849_s30 = int_to_ptr.vmem [resolvable:$true] %s365_s30 }
  0x11   : > { %p1836_p3 = pnand %p1254_p0, %p318_p2  ;;  %s349_s15 = sshll.u32 %s1731_s14, 4  ;;  %s1851_s15 = int_to_ptr.vmem [resolvable:$true] %s349_s15 }
  0x12   : > { %s1534_s16 = scalar_lea.vmem %s337_s26, 320  ;;  %p1542_p11 = scmp.lt.s32.totalorder %s337_s26, %s337_s26 }
  0x13   : > { %s2179_s28 = scalar_select %p1836_p3, 1, 0 }
  0x14   : > { %p1414_p5 = pneg %p1836_p3  ;;  %p1535_p8 = scmp.ne.s32.totalorder %s337_s26, %s1534_s16 }
  0x15   : > { %p1543_p12 = scmp.lt.s32.totalorder %s1534_s16, %s1534_s16 }
  0x16   : > { %p1845_p6 = pnand %p1414_p5, %p2167_p1 }
  0x17   : > { %p1544_p13 = por %p1543_p12, %p1542_p11 }
  0x18   : > { %p1525_p7 = pneg %p1845_p6 }
  0x1a   : > { %p1537_p9 = pnand %p1535_p8, %p1525_p7 }
  0x1c   : > { %p1538_p10 = pneg %p1537_p9 }
  0x1e   : > { %p1545_p0 = pnand %p1544_p13, %p1538_p10 }
  0x20   : > { %1548 = shalt.err (!%p1545_p0)
}
  0x21   : > { %s1732_s17 = smov 64   ;;  %s1733_s18 = smov 4  }
  0x22   : > { %s2181_s3 = sld [smem:[#allocation19_spill]]  ;;  %s1560_s25 = scalar_lea.vmem %s1849_s30, 320 }
  0x23   : > { %p1561_p2 = scmp.ne.s32.totalorder %s1849_s30, %s1560_s25  ;;  %p1568_p9 = scmp.lt.s32.totalorder %s1849_s30, %s1849_s30 }
  0x24   : > { %p1569_p10 = scmp.lt.s32.totalorder %s1560_s25, %s1560_s25 }
  0x25   : > { %p1563_p5 = pnand %p1561_p2, %p1525_p7 }
  0x26   : > { %p1570_p11 = por %p1569_p10, %p1568_p9 }
  0x27   : > { %p1564_p8 = pneg %p1563_p5 }
  0x28   : > { %1417 = dma.hbm_to_vmem [thread:$0]  (!%p1845_p6), %s2181_s3, 320, %s337_s26, [#allocation6], %s1732_s17, %s1732_s17, %s1733_s18  }
  0x29   : > { %p1571_p12 = pnand %p1570_p11, %p1564_p8 }
  0x2b   : > { %1574 = shalt.err (!%p1571_p12)
}
  0x2c   : > { %s2182_s6 = sld [smem:[#allocation21_spill]]  ;;  %s1586_s14 = scalar_lea.vmem %s1851_s15, 320 }
  0x2d   : > { %p1587_p13 = scmp.ne.s32.totalorder %s1851_s15, %s1586_s14  ;;  %p1594_p5 = scmp.lt.s32.totalorder %s1851_s15, %s1851_s15 }
  0x2e   : > { %p1595_p8 = scmp.lt.s32.totalorder %s1586_s14, %s1586_s14 }
  0x2f   : > { %p1589_p0 = pnand %p1587_p13, %p1525_p7 }
  0x30   : > { %p1596_p9 = por %p1595_p8, %p1594_p5 }
  0x31   : > { %p1590_p2 = pneg %p1589_p0 }
  0x32   : > { %1423 = dma.hbm_to_vmem [thread:$0]  (!%p1845_p6), %s2182_s6, 320, %s1849_s30, [#allocation9], %s1732_s17, %s1732_s17, %s1733_s18  }
  0x33   : > { %p1597_p10 = pnand %p1596_p9, %p1590_p2 }
  0x35   : > { %1600 = shalt.err (!%p1597_p10)
}
  0x36   : > { %s2183_s4 = sld [smem:[#allocation20_spill]]  ;;  %s1734_s19 = smov [#allocation10]  }
  0x37   : > { %s381_s20 = sshll.u32 %s1734_s19, 4  ;;  %s382_s20 = int_to_ptr.vmem [resolvable:$true] %s381_s20 }
  0x38   : > { %s1612_s25 = scalar_lea.vmem %s382_s20, 320  ;;  %p1620_p0 = scmp.lt.s32.totalorder %s382_s20, %s382_s20 }
  0x39   : > { %p1613_p11 = scmp.ne.s32.totalorder %s382_s20, %s1612_s25  ;;  %p1621_p2 = scmp.lt.s32.totalorder %s1612_s25, %s1612_s25 }
  0x3b   : > { %p1615_p12 = pnand %p1613_p11, %p1525_p7  ;;  %p1622_p5 = por %p1621_p2, %p1620_p0 }
  0x3c   : > { %1420 = dma.hbm_to_vmem [thread:$0]  (!%p1845_p6), %s2183_s4, 320, %s1851_s15, [#allocation6], %s1732_s17, %s1732_s17, %s1733_s18  }
  0x3d   : > { %p1616_p13 = pneg %p1615_p12 }
  0x3f   : > { %p1623_p8 = pnand %p1622_p5, %p1616_p13 }
  0x41   : > { %1626 = shalt.err (!%p1623_p8)
}
  0x42   : > { %s2184_s8 = sld [smem:[#allocation22_spill]]  ;;  %s1253_s13 = sadd.s32 4294967294, %s1727_s24  }
  0x43   : > { %s1911_s26 = sadd.s32 1, %s1727_s24   ;;  %s37_s16 = sadd.s32 1, %s1723_s23 }
  0x44   : > { %2185 = sst [smem:[#allocation17_spill]] %s1911_s26  ;;  %s34_s14 = ssub.s32 %s1727_s24, %s1911_s26 }
  0x45   : > { %p35_p7 = scmp.eq.s32.totalorder %s34_s14, 0  ;;  %p44_p9 = scmp.ne.s32.totalorder %s1723_s23, %s1719_s22 }
  0x46   : > { %p45_p10 = scmp.eq.s32.totalorder %s1727_s24, 0  ;;  %p50_p11 = scmp.ne.s32.totalorder %s1719_s22, %s1715_s21 }
  0x47   : > { %s1922_s30 = scalar_select %p35_p7, %s1723_s23, %s37_s16  }
  0x48   : > { %1426 = dma.hbm_to_vmem [thread:$0]  (!%p1845_p6), %s2184_s8, 320, %s382_s20, [#allocation9], %s1732_s17, %s1732_s17, %s1733_s18  }
  0x49   : > { %2186 = sst [smem:[#allocation18_spill]] %s1922_s30  ;;  %p1924_p12 = por %p45_p10, %p44_p9 }
  0x4a   : > { %p1930_p6 = por %p2167_p1, %p50_p11  ;;  %p305_p13 = scmp.eq.s32.totalorder %s1831_s27, 1 }
  0x4b   : > { %p311_p0 = scmp.eq.s32.totalorder %s1253_s13, 1  ;;  %p1439_p2 = scmp.lt.s32.totalorder %s1727_s24, 2 }
  0x4c   : > { %s2188_s17 = scalar_select %p1930_p6, 1, 0 }
  0x4d   : > { %s404_s18 = sand.u32 1, %s1723_s23   ;;  %p1937_p5 = por %p305_p13, %p44_p9 }
  0x4e   : > { %p1941_p8 = por %p311_p0, %p50_p11  ;;  %s1260_s15 = sshll.u32 %s404_s18, 3 }
  0x4f   : > { %s2189_s20 = scalar_select %p1937_p5, 1, 0 }
  0x50   : > { %s2190_s25 = scalar_select %p1941_p8, 1, 0 }
  0x51   : > { %s1261_s29 = sshll.u32 %s1727_s24, 7  ;;  %s408_s13 = scalar_lea.vmem [#allocation2], %s1260_s15 }
  0x52   : > { %s1949_s3 = scalar_lea.hbm %s2154_s0, %s1261_s29  ;;  %s415_s4 = sshll.u32 %s408_s13, 4  ;;  %s416_s4 = int_to_ptr.vmem [resolvable:$true] %s415_s4 }
  0x53   : > { %p1953_p7 = pnand %p1439_p2, %p1924_p12  ;;  %s405_s8 = scalar_lea.sflag [#allocation3], %s404_s18 }
  0x54   : > { %s1627_s30 = scalar_lea.hbm %s1949_s3, 128  ;;  %s1632_s16 = scalar_lea.hbm %s2154_s0, 256 }
  0x55   : > { %p1628_p9 = scmp.ne.s32.totalorder %s1949_s3, %s1627_s30  ;;  %p1629_p10 = pneg %p1953_p7 }
  0x56   : > { %p1633_p0 = scmp.lt.s32.totalorder %s1949_s3, %s2154_s0  ;;  %p1634_p12 = scmp.lt.s32.totalorder %s1632_s16, %s1627_s30 }
  0x57   : > { %p1630_p11 = pnand %p1629_p10, %p1628_p9 }
  0x58   : > { %p1635_p2 = por %p1634_p12, %p1633_p0 }
  0x59   : > { %p1631_p13 = pneg %p1630_p11 }
  0x5b   : > { %p1636_p4 = pnand %p1635_p2, %p1631_p13 }
  0x5d   : > { %1639 = shalt.err (!%p1636_p4)
}
  0x5e   : > { %s1640_s19 = scalar_lea.vmem %s416_s4, 128  ;;  %s1735_s18 = smov [#allocation2]  }
  0x5f   : > { %p1641_p1 = scmp.ne.s32.totalorder %s416_s4, %s1640_s19  ;;  %s1645_s23 = sshll.u32 %s1735_s18, 4  ;;  %s1646_s23 = int_to_ptr.vmem [resolvable:$false] %s1645_s23 }
  0x60   : > { %s1647_s26 = scalar_lea.vmem %s1646_s23, 256  ;;  %p1648_p9 = scmp.lt.s32.totalorder %s416_s4, %s1646_s23 }
  0x61   : > { %p1643_p8 = pnand %p1641_p1, %p1629_p10  ;;  %p1649_p11 = scmp.lt.s32.totalorder %s1647_s26, %s1640_s19 }
  0x63   : > { %p1644_p5 = pneg %p1643_p8  ;;  %p1650_p6 = por %p1649_p11, %p1648_p9 }
  0x65   : > { %p1651_p3 = pnand %p1650_p6, %p1644_p5 }
  0x67   : > { %1654 = shalt.err (!%p1651_p3)
}
  0x68   : > { %1430 = dma.hbm_to_vmem [thread:$0]  (!%p1953_p7), %s1949_s3, 128, %s416_s4, %s405_s8  }
  0x69   : > { %p2192_p13 = scmp.ne.s32.totalorder %s2179_s28, 0 }
  0x6a   : > { %s1974_s30 = sand.u32 (!%p2192_p13), 1, %s1719_s22   ;;  %p2193_p1 = scmp.ne.s32.totalorder (!%p2192_p13), %s2188_s17, 0 }
  0x6b   : > { %424 = sbr.rel (%p2192_p13) target bundleno = 2476 (0x9ac), region = 68  ;;  %s1263_s29 = sshll.u32 (!%p2192_p13), %s1974_s30, 3 }
  0x6c   : > { %s427_s23 = scalar_lea.sflag (!%p2192_p13), [#allocation3], %s1974_s30  ;;  %s430_s26 = scalar_lea.vmem (!%p2192_p13), [#allocation2], %s1263_s29 }
  0x70   : > { %1698 = dma.done.wait (%p2193_p1), %s427_s23, 128  }
  0x71   : > { %1700 = vsyncadd (%p2193_p1), %s427_s23, 4294967168  ;;  %p2194_p3 = scmp.eq.s32.totalorder %s1831_s27, 0 }
  0x73   : > { %1702 = dma.done.wait (%p2194_p3), [#allocation6], 640   ;;  %p2195_p4 = pmov %p2194_p3 }
  0x74   : > { %p2196_p6 = pmov %p2194_p3 }
  0x75   : > { %1704 = vsyncadd (%p2195_p4), [#allocation6], 4294966656 }
  0x76   : > { %1706 = dma.done.wait (%p2196_p6), [#allocation9], 640   ;;  %p2197_p5 = pmov %p2194_p3 }
  0x77   : > { %vm491_vm0 = vcmask 326656   ;;  %v488_v0 = vld [vmem:[%s430_s26] sm:$0xff]  ;;  %vm544_vm1 = vcmask 1043456   ;;  %v1736_v8 = vmov 0.0   ;;  %vm1737_vm2 = vmmov 0   ;;  %v1492_v10 = vld [vmem:[#allocation5 + $0x8] sm:$0xff]  }
  0x78   : > { %1708 = vsyncadd (%p2197_p5), [#allocation9], 4294966656  ;;  %v492_v1 = vsel %vm491_vm0, %v488_v0, 0.0  ;;  %v1491_v7 = vld [vmem:[#allocation5 + $0x10] ss:$0 sps:$4 sm:$0xff]   ;;  %1332 = vmatprep.subr.bf16.mxu0 %v1736_v8  ;;  %1342 = vmatprep.subr.mxu1 %v1736_v8  ;;  %v1493_v11 = vld [vmem:[#allocation5] sm:$0xff]   ;;  %v588_v22 = vlaneseq }
  0x79   : > { %493 = vadd.xlane.f32.xlu0 %v492_v1  ;;  %v546_v9 = vsel %vm544_vm1, %v1491_v7, 0  ;;  %1338 = vmatprep.mubr.msk.bf16.mxu0 %vm1737_vm2, %v1736_v8  ;;  %v1269_v16 = vld [vmem:[%s2155_s1] ss:$0 sm:$0xff]  ;;  %s1738_s28 = smov 88   ;;  %vm749_vm13 = vcmask 195712   ;;  %vm733_vm14 = vcmask 130112  }
  0x7a   : > { %1350 = vmatprep.mubr.msk.f32.mxu1 %vm1737_vm2, %v1736_v8  ;;  %1333 = vmatpush3.bf16.msra.mxu0 %v546_v9  ;;  %v1270_v18 = vld [vmem:[%s2156_s2] ss:$0 sm:$0xff]  ;;  %v589_v23 = vand.u32 127, %v588_v22  ;;  %vm765_vm15 = vcmask 261312   ;;  %s1739_s17 = smov 112   ;;  %s1740_s14 = smov 120  }
  0x7b   : > { %1334 = vmatprep.subr.bf16.mxu0 %v1736_v8  ;;  %s1741_s16 = smov 80   ;;  %s1742_s15 = smov 104  }
  0x7c   : > { %vm605_vm3 = vcmp.ge.s32.totalorder %v589_v23, 30  ;;  %vm606_vm4 = vcmp.lt.s32.totalorder %v589_v23, 40  ;;  %vm600_vm6 = vcmp.ge.s32.totalorder %v589_v23, 20  ;;  %vm601_vm7 = vcmp.lt.s32.totalorder %v589_v23, 30  ;;  %s1743_s13 = smov 48   ;;  %p2198_p7 = scmp.ne.s32.totalorder %s2189_s20, 0 }
  0x7d   : > { %vm607_vm5 = vmand %vm605_vm3, %vm606_vm4  ;;  %vm595_vm9 = vcmp.ge.s32.totalorder %v589_v23, 10  ;;  %vm596_vm10 = vcmp.lt.s32.totalorder %v589_v23, 20  ;;  %vm591_vm12 = vcmp.lt.s32.totalorder %v589_v23, 10  ;;  %vm721_vm3 = vcmask 64512   ;;  %s1744_s23 = smov [#allocation11]  }
  0x7e   : > { %1335 = vmatpush3.bf16.msra.mxu0 %v1492_v10  ;;  %v2018_v24 = vsel %vm607_vm5, 1.0, %v1736_v8  ;;  %vm602_vm8 = vmand %vm600_vm6, %vm601_vm7  ;;  %v1275_v34 = vsel %vm591_vm12, 1.0, %v1736_v8  ;;  %vm782_vm4 = vcmask 130048   ;;  %vm784_vm5 = vcmask 195584   ;;  %s1659_s26 = sshll.u32 %s1744_s23, 4  ;;  %s1660_s26 = int_to_ptr.vmem [resolvable:$false] %s1659_s26 }
  0x7f   : > { %1336 = vmatprep.subr.bf16.mxu0 %v1736_v8  ;;  %v1277_v28 = vsel %vm602_vm8, 1.0, %v1736_v8  ;;  %vm597_vm11 = vmand %vm595_vm9, %vm596_vm10  ;;  %vm802_vm6 = vcmask 261120   ;;  %s1661_s3 = scalar_lea.vmem %s1660_s26, 256 }
  0x80   : > { %v1276_v32 = vsel %vm597_vm11, 1.0, %v1736_v8 }
  0x82   : > { %1337 = vmatpush3.bf16.msra.mxu0 %v1493_v11  ;;  %v1494_v11 = vld [vmem:[#allocation7 + $0x10] ss:$0 sps:$4 sm:$0xff]  }
  0x83   : > { %1353 = vmatprep.subr.mxu0 %v1736_v8 }
 0x102   : > { %v494_v2 = vpop.xlane.xlu0 %493 }
 0x103   : > { %v496_v3 = vmul.f32 0.025, %v494_v2 }
 0x105   : > { %v497_v4 = vsub.f32 %v488_v0, %v496_v3 }
 0x107   : > { %v498_v5 = vmul.f32 %v497_v4, %v497_v4 }
 0x109   : > { %v499_v6 = vsel %vm491_vm0, %v498_v5, 0.0 }
 0x10a   : > { %500 = vadd.xlane.f32.xlu0 %v499_v6 }
 0x193   : > { %v501_v12 = vpop.xlane.xlu0 %500 }
 0x194   : > { %v502_v13 = vmul.f32 0.025, %v501_v12  ;;  %v908_v12 = vsel %vm544_vm1, %v1494_v11, 0 }
 0x196   : > { %v503_v14 = vadd.f32 1e-05, %v502_v13  ;;  %v1495_v13 = vld [vmem:[#allocation7 + $0x8] sm:$0xff]  }
 0x198   : > { %1503 = vrsqrt.f32 %v503_v14 }
 0x1a5   : > { %v1504_v15 = vpop.eup %1503 }
 0x1a6   : > { %v505_v17 = vmul.f32 %v1504_v15, %v497_v4 }
 0x1a8   : > { %v512_v19 = vmul.f32 %v1269_v16, %v505_v17 }
 0x1aa   : > { %v2010_v20 = vadd.f32 %v1270_v18, %v512_v19 }
 0x1ac   : > { %v520_v21 = vpack.c.bf16 %v2010_v20, %v2010_v20 }
 0x1ae   : > { %1339 = vmatmul.mubr.msk.bf16.vlgmr.msra.gmra.mxu0 %vm491_vm0, %v520_v21 }
 0x1af   : > { %1361 = vmatprep.mubr.msk.f32.mxu0 %vm1737_vm2, %v1736_v8 }
 0x26e   : > { %v2020_v25 = vpop.f32.mrf.mxu0 }
 0x26f   : > { %635 = vrot.lane.b32.xlu1 %v2020_v25, %s1738_s28  ;;  %v613_v26 = vmul.f32 %v2018_v24, %v2020_v25  ;;  %v612_v30 = vmul.f32 %v1277_v28, %v2020_v25  ;;  %v611_v33 = vmul.f32 %v1276_v32, %v2020_v25  ;;  %v610_v35 = vmul.f32 %v1275_v34, %v2020_v25 }
 0x270   : > { %v1340_v27 = vpop.f32.mrf.mxu0 }
 0x271   : > { %1343 = vmatpush3.xpose.msk.msra.mxu1 %vm491_vm0, %v613_v26 }
 0x272   : > { %v585_v29 = vpop.f32.mrf.mxu0  ;;  %1344 = vmatprep.subr.mxu1 %v1736_v8 }
 0x274   : > { %v1341_v31 = vpop.f32.mrf.mxu0 }
 0x275   : > { %1345 = vmatpush3.xpose.msk.msra.mxu1 %vm491_vm0, %v612_v30 }
 0x276   : > { %1346 = vmatprep.subr.mxu1 %v1736_v8 }
 0x279   : > { %1347 = vmatpush3.xpose.msk.msra.mxu1 %vm491_vm0, %v611_v33 }
 0x27a   : > { %1348 = vmatprep.subr.mxu1 %v1736_v8 }
 0x27d   : > { %1349 = vmatpush3.xpose.msk.msra.mxu1 %vm491_vm0, %v610_v35 }
 0x27e   : > { %1364 = vmatprep.subr.bf16.mxu1 %v1736_v8 }
 0x2e1   : > { %v636_v36 = vpop.permute.xlu1 %635 }
 0x2e2   : > { %1351 = vmatmul.mubr.msk.f32.vlgmr.msra.gmra.mxu1 %vm491_vm0, %v636_v36 }
 0x2e3   : > { %1370 = vmatprep.mubr.msk.bf16.mxu1 %vm1737_vm2, %v1736_v8  ;;  %1365 = vmatpush3.bf16.msra.mxu1 %v908_v12 }
 0x2e4   : > { %1366 = vmatprep.subr.bf16.mxu1 %v1736_v8 }
 0x2e7   : > { %1367 = vmatpush3.bf16.msra.mxu1 %v1495_v13 }
 0x2e8   : > { %1368 = vmatprep.subr.bf16.mxu1 %v1736_v8 }
 0x3a2   : > { %v717_v37 = vpop.f32.mrf.mxu1 }
 0x3a3   : > { %v750_v38 = vsel %vm749_vm13, %v717_v37, -inf  ;;  %v734_v39 = vsel %vm733_vm14, %v717_v37, -inf  ;;  %v766_v41 = vsel %vm765_vm15, %v717_v37, -inf  ;;  %v722_v42 = vsel %vm721_vm3, %v717_v37, -inf }
 0x3a4   : > { %751 = vmax.xlane.f32.xlu0 %v750_v38  ;;  %735 = vmax.xlane.f32.xlu1 %v734_v39  ;;  %v1352_v40 = vpop.f32.mrf.mxu1  ;;  %v1285_v38 = vld [vmem:[%s2159_s5] ss:$0 sm:$0xff] }
 0x3a8   : > { %767 = vmax.xlane.f32.xlu0 %v766_v41 }
 0x3ac   : > { %723 = vmax.xlane.f32.xlu0 %v722_v42 }
 0x42d   : > { %v752_v43 = vpop.xlane.xlu0 %751  ;;  %v736_v44 = vpop.xlane.xlu1 %735 }
 0x42e   : > { %v753_v45 = vsub.f32 %v717_v37, %v752_v43  ;;  %v737_v46 = vsub.f32 %v717_v37, %v736_v44 }
 0x430   : > { %v754_v47 = vmul.f32 1.442695, %v753_v45  ;;  %v738_v48 = vmul.f32 1.442695, %v737_v46 }
 0x431   : > { %v768_v49 = vpop.xlane.xlu0 %767 }
 0x432   : > { %1505 = vpow2.f32 %v754_v47  ;;  %v769_v50 = vsub.f32 %v717_v37, %v768_v49 }
 0x433   : > { %1507 = vpow2.f32 %v738_v48 }
 0x434   : > { %v770_v51 = vmul.f32 1.442695, %v769_v50 }
 0x435   : > { %v724_v55 = vpop.xlane.xlu0 %723 }
 0x436   : > { %1509 = vpow2.f32 %v770_v51  ;;  %v725_v56 = vsub.f32 %v717_v37, %v724_v55  ;;  %v1497_v51 = vld [vmem:[#allocation8 + $0x10] ss:$0 sps:$4 sm:$0xff]  }
 0x438   : > { %v726_v57 = vmul.f32 1.442695, %v725_v56 }
 0x43a   : > { %1511 = vpow2.f32 %v726_v57 }
 0x43f   : > { %v2043_v52 = vpop.eup %1505 }
 0x440   : > { %v2045_v53 = vpop.eup %1507  ;;  %757 = vrot.lane.b32.xlu1 %v2043_v52, %s1739_s17 }
 0x441   : > { %741 = vrot.lane.b32.xlu0 %v2045_v53, %s1740_s14  ;;  %s1303_s14 = sshll.u32 %s1831_s27, 7  ;;  %s1132_s27 = scalar_lea.sflag [#allocation4], %s1974_s30 }
 0x442   : > { %s2110_s18 = scalar_lea.hbm %s2166_s12, %s1303_s14 }
 0x443   : > { %v2049_v54 = vpop.eup %1509 }
 0x444   : > { %615 = vrot.lane.b32.xlu1 %v1275_v34, %s1741_s16  ;;  %v1496_v34 = vld [vmem:[#allocation7] sm:$0xff]  }
 0x445   : > { %773 = vrot.lane.b32.xlu0 %v2049_v54, %s1742_s15  ;;  %1369 = vmatpush3.bf16.msra.mxu1 %v1496_v34 }
 0x446   : > { %1384 = vmatprep.subr.bf16.mxu1 %v1736_v8 }
 0x447   : > { %v1512_v58 = vpop.eup %1511 }
 0x448   : > { %v728_v59 = vsel %vm721_vm3, %v1512_v58, 0.0 }
 0x449   : > { %630 = vrot.lane.b32.xlu0 %v2018_v24, %s1741_s16 }
 0x44d   : > { %625 = vrot.lane.b32.xlu0 %v1277_v28, %s1741_s16 }
 0x451   : > { %620 = vrot.lane.b32.xlu0 %v1276_v32, %s1741_s16  ;;  %s486_s16 = scalar_lea.vmem [#allocation11], %s1263_s29 }
 0x452   : > { %s1145_s15 = sshll.u32 %s486_s16, 4  ;;  %s2112_s15 = int_to_ptr.vmem [resolvable:$true] %s1145_s15 }
 0x453   : > { %s1655_s29 = scalar_lea.vmem %s2112_s15, 128  ;;  %p1662_p12 = scmp.lt.s32.totalorder %s2112_s15, %s1660_s26 }
 0x454   : > { %p1656_p8 = scmp.ne.s32.totalorder %s2112_s15, %s1655_s29  ;;  %p1663_p2 = scmp.lt.s32.totalorder %s1661_s3, %s1655_s29 }
 0x456   : > { %p1657_p10 = pnand %p1656_p8, %p2198_p7  ;;  %p1664_p9 = por %p1663_p2, %p1662_p12 }
 0x458   : > { %p1658_p0 = pneg %p1657_p10 }
 0x45a   : > { %p1665_p11 = pnand %p1664_p9, %p1658_p0 }
 0x470   : > { %729 = vadd.xlane.f32.xlu0 %v728_v59 }
 0x4b2   : > { %v758_v60 = vpop.permute.xlu1 %757 }
 0x4b3   : > { %v742_v61 = vpop.permute.xlu0 %741  ;;  %v760_v62 = vsel %vm721_vm3, %v758_v60, 0.0  ;;  %v1290_v60 = vld [vmem:[%s2164_s10] ss:$0 sm:$0xff] }
 0x4b4   : > { %761 = vadd.xlane.f32.xlu0 %v760_v62  ;;  %v744_v63 = vsel %vm721_vm3, %v742_v61, 0.0  ;;  %v1291_v62 = vld [vmem:[%s2165_s11] ss:$0 sm:$0xff] }
 0x4b5   : > { %745 = vadd.xlane.f32.xlu1 %v744_v63 }
 0x4b6   : > { %v616_v7 = vpop.permute.xlu1 %615 }
 0x4b7   : > { %v774_v0 = vpop.permute.xlu0 %773  ;;  %v618_v9 = vmul.f32 %v616_v7, %v2020_v25 }
 0x4b8   : > { %v776_v1 = vsel %vm721_vm3, %v774_v0, 0.0 }
 0x4b9   : > { %777 = vadd.xlane.f32.xlu0 %v776_v1 }
 0x4bb   : > { %v631_v2 = vpop.permute.xlu0 %630 }
 0x4bc   : > { %v633_v10 = vmul.f32 %v631_v2, %v2020_v25  ;;  %v1501_v2 = vld [vmem:[#allocation10 + $0x8] sm:$0xff]  }
 0x4bf   : > { %v626_v3 = vpop.permute.xlu0 %625 }
 0x4c0   : > { %v628_v4 = vmul.f32 %v626_v3, %v2020_v25  ;;  %v1502_v3 = vld [vmem:[#allocation10] sm:$0xff]  }
 0x4c3   : > { %v621_v5 = vpop.permute.xlu0 %620 }
 0x4c4   : > { %v623_v6 = vmul.f32 %v621_v5, %v2020_v25 }
 0x4c6   : > { %794 = vrot.lane.b32.xlu1 %v628_v4, %s1743_s13  ;;  %v1292_v4 = vld [vmem:[%s2161_s7] ss:$0 sm:$0xff] }
 0x4ca   : > { %792 = vrot.lane.b32.xlu1 %v623_v6, %s1743_s13 }
 0x4ce   : > { %790 = vrot.lane.b32.xlu1 %v618_v9, %s1743_s13 }
 0x4cf   : > { %796 = vrot.lane.b32.xlu0 %v633_v10, %s1743_s13 }
 0x4f9   : > { %v730_v14 = vpop.xlane.xlu0 %729 }
 0x4fa   : > { %1513 = vrcp.f32 %v730_v14 }
 0x507   : > { %v1514_v22 = vpop.eup %1513 }
 0x508   : > { %v732_v26 = vmul.f32 %v1514_v22, %v1512_v58 }
 0x53d   : > { %v762_v15 = vpop.xlane.xlu0 %761 }
 0x53e   : > { %v746_v16 = vpop.xlane.xlu1 %745  ;;  %1515 = vrcp.f32 %v762_v15 }
 0x53f   : > { %1517 = vrcp.f32 %v746_v16 }
 0x542   : > { %v795_v17 = vpop.permute.xlu1 %794  ;;  %v778_v18 = vpop.xlane.xlu0 %777 }
 0x543   : > { %1519 = vrcp.f32 %v778_v18 }
 0x546   : > { %v793_v19 = vpop.permute.xlu1 %792  ;;  %v797_v21 = vpop.permute.xlu0 %796 }
 0x547   : > { %1354 = vmatpush3.msra.mxu0 %v797_v21 }
 0x548   : > { %1355 = vmatprep.subr.mxu0 %v1736_v8 }
 0x549   : > { %1356 = vmatpush3.msra.mxu0 %v795_v17 }
 0x54a   : > { %1357 = vmatprep.subr.mxu0 %v1736_v8  ;;  %v791_v25 = vpop.permute.xlu1 %790 }
 0x54b   : > { %v1516_v23 = vpop.eup %1515  ;;  %1358 = vmatpush3.msra.mxu0 %v793_v19 }
 0x54c   : > { %v1518_v24 = vpop.eup %1517  ;;  %1359 = vmatprep.subr.mxu0 %v1736_v8  ;;  %v764_v28 = vmul.f32 %v1516_v23, %v2043_v52  ;;  %v1012_v52 = vsel %vm544_vm1, %v1497_v51, 0 }
 0x54d   : > { %v748_v27 = vmul.f32 %v1518_v24, %v2045_v53  ;;  %1360 = vmatpush3.msra.mxu0 %v791_v25  ;;  %v1498_v53 = vld [vmem:[#allocation8 + $0x8] sm:$0xff]  }
 0x54e   : > { %1374 = vmatprep.subr.bf16.mxu0 %v1736_v8 }
 0x54f   : > { %v781_v29 = vsel %vm721_vm3, %v732_v26, %v748_v27 }
 0x550   : > { %v1520_v30 = vpop.eup %1519  ;;  %v783_v32 = vsel %vm782_vm4, %v781_v29, %v764_v28 }
 0x551   : > { %v780_v31 = vmul.f32 %v1520_v30, %v2049_v54  ;;  %v1500_v54 = vld [vmem:[#allocation10 + $0x10] ss:$0 sps:$4 sm:$0xff]  }
 0x552   : > { %v1087_v55 = vsel %vm544_vm1, %v1500_v54, 0 }
 0x553   : > { %v785_v33 = vsel %vm784_vm5, %v783_v32, %v780_v31 }
 0x554   : > { %1362 = vmatmul.mubr.msk.f32.vlgmr.msra.gmra.mxu0 %vm802_vm6, %v785_v33 }
 0x555   : > { %1380 = vmatprep.mubr.msk.bf16.mxu0 %vm1737_vm2, %v1736_v8  ;;  %1375 = vmatpush3.bf16.msra.mxu0 %v1012_v52 }
 0x556   : > { %1376 = vmatprep.subr.bf16.mxu0 %v1736_v8 }
 0x559   : > { %1377 = vmatpush3.bf16.msra.mxu0 %v1498_v53 }
 0x55a   : > { %1378 = vmatprep.subr.bf16.mxu0 %v1736_v8 }
 0x614   : > { %v872_v35 = vpop.f32.mrf.mxu0 }
 0x615   : > { %v876_v36 = vpack.c.bf16 %v872_v35, %v872_v35 }
 0x616   : > { %v1363_v37 = vpop.f32.mrf.mxu0 }
 0x617   : > { %1371 = vmatmul.mubr.msk.bf16.vlgmr.msra.gmra.mxu1 %vm491_vm0, %v876_v36 }
 0x618   : > { %1390 = vmatprep.mubr.msk.bf16.mxu1 %vm1737_vm2, %v1736_v8  ;;  %1385 = vmatpush3.bf16.msra.mxu1 %v1087_v55 }
 0x619   : > { %1386 = vmatprep.subr.bf16.mxu1 %v1736_v8 }
 0x61c   : > { %1387 = vmatpush3.bf16.msra.mxu1 %v1501_v2 }
 0x61d   : > { %1388 = vmatprep.subr.bf16.mxu1 %v1736_v8  ;;  %v1297_v8 = vld [vmem:[%s2163_s9] ss:$0 sm:$0xff] }
 0x620   : > { %1389 = vmatpush3.bf16.msra.mxu1 %v1502_v3 }
 0x6d7   : > { %v944_v39 = vpop.f32.mrf.mxu1 }
 0x6d8   : > { %v945_v40 = vadd.f32 %v1285_v38, %v944_v39 }
 0x6d9   : > { %v1372_v41 = vpop.f32.mrf.mxu1 }
 0x6da   : > { %v950_v42 = vadd.f32 %v945_v40, %v2010_v20  ;;  %v1499_v20 = vld [vmem:[#allocation8] sm:$0xff]  }
 0x6db   : > { %v947_v43 = vpop.f32.mrf.mxu1  ;;  %1379 = vmatpush3.bf16.msra.mxu0 %v1499_v20 }
 0x6dc   : > { %v953_v44 = vsel %vm491_vm0, %v950_v42, 0.0 }
 0x6dd   : > { %954 = vadd.xlane.f32.xlu0 %v953_v44  ;;  %v1373_v45 = vpop.f32.mrf.mxu1 }
 0x766   : > { %v955_v46 = vpop.xlane.xlu0 %954 }
 0x767   : > { %v956_v47 = vmul.f32 0.025, %v955_v46 }
 0x769   : > { %v957_v48 = vsub.f32 %v950_v42, %v956_v47 }
 0x76b   : > { %v958_v49 = vmul.f32 %v957_v48, %v957_v48 }
 0x76d   : > { %v959_v50 = vsel %vm491_vm0, %v958_v49, 0.0 }
 0x76e   : > { %960 = vadd.xlane.f32.xlu1 %v959_v50 }
 0x7f7   : > { %v961_v56 = vpop.xlane.xlu1 %960 }
 0x7f8   : > { %v962_v57 = vmul.f32 0.025, %v961_v56 }
 0x7fa   : > { %v963_v58 = vadd.f32 1e-05, %v962_v57 }
 0x7fc   : > { %1521 = vrsqrt.f32 %v963_v58 }
 0x809   : > { %v1522_v59 = vpop.eup %1521 }
 0x80a   : > { %v965_v61 = vmul.f32 %v1522_v59, %v957_v48 }
 0x80c   : > { %v972_v63 = vmul.f32 %v1290_v60, %v965_v61 }
 0x80e   : > { %v979_v0 = vadd.f32 %v1291_v62, %v972_v63 }
 0x810   : > { %v980_v1 = vpack.c.bf16 %v979_v0, %v979_v0 }
 0x812   : > { %1381 = vmatmul.mubr.msk.bf16.vlgmr.msra.gmra.mxu0 %vm491_vm0, %v980_v1 }
 0x8d2   : > { %v1048_v5 = vpop.f32.mrf.mxu0 }
 0x8d3   : > { %v1049_v6 = vadd.f32 %v1292_v4, %v1048_v5 }
 0x8d4   : > { %v1382_v7 = vpop.f32.mrf.mxu0 }
 0x8d5   : > { %v1054_v9 = vmax.f32 %v1049_v6, 0.0 }
 0x8d6   : > { %v1051_v10 = vpop.f32.mrf.mxu0 }
 0x8d7   : > { %v1055_v11 = vpack.c.bf16 %v1054_v9, %v1054_v9 }
 0x8d8   : > { %v1383_v12 = vpop.f32.mrf.mxu0 }
 0x8d9   : > { %1391 = vmatmul.mubr.msk.bf16.vlgmr.msra.gmra.mxu1 %vm491_vm0, %v1055_v11 }
 0x999   : > { %v1123_v13 = vpop.f32.mrf.mxu1 }
 0x99a   : > { %v1124_v14 = vadd.f32 %v1297_v8, %v1123_v13 }
 0x99b   : > { %v1392_v15 = vpop.f32.mrf.mxu1 }
 0x99c   : > { %v1129_v16 = vadd.f32 %v1124_v14, %v979_v0 }
 0x99d   : > { %v1126_v17 = vpop.f32.mrf.mxu1 }
 0x99e   : > { %1130 = vst.msk [vmem:[%s486_s16] sm:$0xff] %vm491_vm0, %v1129_v16 }
 0x99f   : > { %v1393_v18 = vpop.f32.mrf.mxu1 }
 0x9a0   : > { %1668 = shalt.err (!%p1665_p11)
}
 0x9a1   : > { %s1669_s4 = scalar_lea.hbm %s2110_s18, 128  ;;  %s1673_s8 = scalar_lea.hbm %s2166_s12, 256 }
 0x9a2   : > { %p1670_p13 = scmp.ne.s32.totalorder %s2110_s18, %s1669_s4  ;;  %p1674_p4 = scmp.lt.s32.totalorder %s2110_s18, %s2166_s12 }
 0x9a3   : > { %p1675_p6 = scmp.lt.s32.totalorder %s1673_s8, %s1669_s4 }
 0x9a4   : > { %p1671_p1 = pnand %p1670_p13, %p2198_p7 }
 0x9a5   : > { %p1676_p5 = por %p1675_p6, %p1674_p4 }
 0x9a6   : > { %p1672_p3 = pneg %p1671_p1 }
 0x9a8   : > { %p1677_p8 = pnand %p1676_p5, %p1672_p3 }
 0x9aa   : > { %1680 = shalt.err (!%p1677_p8)
}
 0x9ab   : > { %1412 = dma.vmem_to_hbm [thread:$0]  (%p2198_p7), %s2112_s15, 128, %s2110_s18, %s1132_s27  }
 0x9ac PF: > { %s1157_s14 = sand.u32 1, %s1715_s21   ;;  %p2199_p10 = scmp.ne.s32.totalorder %s2190_s25, 0 }
 0x9ad   : > { %p2200_p0 = scmp.ge.s32.totalorder %s1727_s24, 2  ;;  %s1158_s16 = scalar_lea.sflag [#allocation4], %s1157_s14 }
 0x9af   : > { %p1432_p12 = pnand %p2200_p0, %p2199_p10 }
 0x9b1   : > { %p1433_p2 = pneg %p1432_p12 }
 0x9b3   : > { %1710 = dma.done.wait (%p1433_p2), %s1158_s16, 128  }
 0x9b4   : > { %1712 = vsyncadd (%p1433_p2), %s1158_s16, 4294967168  ;;  %s2201_s24 = sld [smem:[#allocation17_spill]]  ;;  %s2204_s21 = smov %s1719_s22 }
 0x9b5   : > { %s2202_s13 = sld [smem:[#allocation16_spill]] }
 0x9b6   : > { %s2203_s23 = sld [smem:[#allocation18_spill]] }
 0x9ba   : > { %p27_p9 = scmp.ge.s32.totalorder %s2201_s24, 4  }
 0x9bb   : > { %s2205_s22 = smov %s2202_s13 }
 0x9bc   :  { %29 = sbr.rel (!%p27_p9) target bundleno = 12 (0xc), region = 129 }
 0x9c1   :  { %1163 = vsyncpa [#allocation3], 1 }
 0x9c2   :  { %1165 = vsyncpa [#allocation3 + $0x1], 1 }
 0x9c3   :  { %1166 = vsyncpa [#allocation6], 1 }
 0x9c4   :  { %1167 = vsyncpa [#allocation9], 1 }
 0x9c5   :  { %1168 = vsyncpa [#allocation4], 1 }
 0x9c6   :  { %1170 = vsyncpa [#allocation4 + $0x1], 1 }

</bundles_post_ra>
